<compile_context>
chip_gen: v6e
topology: v6e:2x2x1
jax: 0.10.0
libtpu: 0.0.40
codegen_flags: <defaults>
</compile_context>

<pallas_src>
import jax
import jax.numpy as jnp
from jax.experimental import pallas as pl
from jax.experimental.pallas import tpu as pltpu


def _round_up(x: int, m: int) -> int:
    return (x + m - 1) // m * m


def ff_softmax_kernel(x_ref, w_ref, b_ref, mask_ref, o_ref):
    # x_ref:    (TB, K_pad)     storage dtype, pipelined batch tile
    # w_ref:    (K_pad, N_pad)  storage dtype, pre-transposed, VMEM-resident (1 buffer)
    # b_ref:    (1, N_pad)      f32 bias, resident
    # mask_ref: (1, N_pad)      f32 additive lane mask (0 valid / -1e30 padded), resident
    # o_ref:    (TB, N_pad)
    x = x_ref[...]
    xf = x.astype(jnp.float32)

    # Row L2 norm over the feature axis (padded K columns are zero -> no effect).
    # Reciprocal goes to the EUP slot (approx=True), eps kept outside the sqrt
    # as in the PyTorch reference.
    sumsq = jnp.sum(xf * xf, axis=1, keepdims=True)
    inv_norm = pl.reciprocal(jnp.sqrt(sumsq) + 1e-8, approx=True)

    # MXU matmul in the storage dtype with f32 accumulation; canonical [K, N]
    # weight layout (no in-kernel transpose).  Row scaling commutes with the
    # linear map, so the normalization is applied to the f32 accumulator.
    y = jnp.dot(x, w_ref[...], preferred_element_type=jnp.float32)
    y = y * inv_norm + b_ref[...]

    # ReLU, then push padded output lanes to -inf-ish so they drop out of the
    # softmax denominator (mask is all zeros when N is already 128-aligned).
    y = jnp.maximum(y, 0.0) + mask_ref[...]

    # Numerically-stable softmax over dim=1 (output-feature axis).
    m = jnp.max(y, axis=1, keepdims=True)
    e = jnp.exp(y - m)
    s = jnp.sum(e, axis=1, keepdims=True)
    o_ref[...] = (e * pl.reciprocal(s, approx=False)).astype(o_ref.dtype)


def ff_softmax_layer(x, weight, bias, *, block_b: int = 256):
    """x: [B, in_features], weight: [out_features, in_features] (PyTorch layout),
    bias: [out_features].  Returns softmax(ReLU(l2norm(x) @ W.T + b)), [B, out]."""
    B, K = x.shape
    N, K_w = weight.shape
    assert K == K_w, "weight must be [out_features, in_features]"

    # Lane-dense padded shapes.
    K_pad = _round_up(K, 128)
    N_pad = _round_up(N, 128)

    # Batch tile rounded to the dtype sublane multiple and capped at the
    # (sublane-rounded) batch so small/odd B does not blow up padded work.
    sub = max(8, 32 // x.dtype.itemsize)          # 8 f32 / 16 bf16 / 32 int8
    TB = _round_up(min(block_b, _round_up(B, sub)), sub)
    B_pad = _round_up(B, TB)

    if (B_pad, K_pad) != (B, K):
        x = jnp.pad(x, ((0, B_pad - B), (0, K_pad - K)))
    # One-time transpose to [K_pad, N_pad]: MXU-friendly K-major resident weight.
    w_t = jnp.pad(weight, ((0, N_pad - N), (0, K_pad - K))).T
    b2 = jnp.pad(bias.astype(jnp.float32), (0, N_pad - N)).reshape(1, N_pad)
    mask = jnp.where(jnp.arange(N_pad) < N, 0.0, -1e30).astype(jnp.float32)
    mask = mask.reshape(1, N_pad)

    grid = (B_pad // TB,)

    itemsize = x.dtype.itemsize
    vmem_needed = (w_t.size * w_t.dtype.itemsize          # single-buffered weight
                   + (b2.size + mask.size) * 4            # resident bias + mask
                   + 2 * TB * K_pad * itemsize            # double-buffered x tiles
                   + 2 * TB * N_pad * itemsize)           # double-buffered out tiles
    vmem_limit = int(min(100 * 2**20, max(vmem_needed * 5 // 4 + (4 << 20), 16 << 20)))

    cost = pl.CostEstimate(
        flops=2 * B_pad * K_pad * N_pad,
        transcendentals=B_pad * N_pad + B_pad,             # softmax exp + norm recip
        bytes_accessed=(x.size * itemsize
                        + w_t.size * w_t.dtype.itemsize
                        + (b2.size + mask.size) * 4
                        + B_pad * N_pad * itemsize))

    out = pl.pallas_call(
        ff_softmax_kernel,
        out_shape=jax.ShapeDtypeStruct((B_pad, N_pad), x.dtype),
        grid_spec=pltpu.PrefetchScalarGridSpec(
            num_scalar_prefetch=0,
            grid=grid,
            in_specs=[
                # Pipelined batch tiles (default double buffering).
                pl.BlockSpec((TB, K_pad), lambda i: (i, 0)),
                # Grid-invariant operands: single-buffered, VMEM-resident.
                pl.BlockSpec((K_pad, N_pad), lambda i: (0, 0),
                             pipeline_mode=pl.Buffered(1)),
                pl.BlockSpec((1, N_pad), lambda i: (0, 0),
                             pipeline_mode=pl.Buffered(1)),
                pl.BlockSpec((1, N_pad), lambda i: (0, 0),
                             pipeline_mode=pl.Buffered(1)),
            ],
            out_specs=pl.BlockSpec((TB, N_pad), lambda i: (i, 0)),
        ),
        compiler_params=pltpu.CompilerParams(
            dimension_semantics=("parallel",),
            vmem_limit_bytes=vmem_limit),
        cost_estimate=cost,
    )(x, w_t, b2, mask)

    # Strip batch / output-feature padding.
    return out[:B, :N]


def _reference(x, weight, bias):
    # Pure-JAX f32 reference of the same forward pass.
    norm = jnp.sqrt(jnp.sum(x * x, axis=1, keepdims=True))
    xn = x / (norm + 1e-8)
    y = xn @ weight.T + bias
    y = jnp.maximum(y, 0.0)
    return jax.nn.softmax(y, axis=1)


if __name__ == "__main__":
    B, in_features, out_features = 8, 32, 16

    key = jax.random.PRNGKey(0)
    kx, kw, kb = jax.random.split(key, 3)

    # Deterministic parameter init (nn.Linear-style uniform bound 1/sqrt(fan_in)).
    bound = 1.0 / (in_features ** 0.5)
    weight = jax.random.uniform(kw, (out_features, in_features),
                                jnp.float32, -bound, bound)
    bias = jax.random.uniform(kb, (out_features,), jnp.float32, -bound, bound)

    x = jax.random.normal(kx, (B, in_features), jnp.float32)

    out = ff_softmax_layer(x, weight, bias)
    out = jax.block_until_ready(out)

    ref = _reference(x, weight, bias)
    assert out.shape == (B, out_features)
    # approx=True EUP reciprocal for the L2 norm introduces ~1e-4 relative drift
    # vs. the exact-f32 reference, hence the 2e-3 tolerance.
    assert jnp.allclose(out, ref, atol=2e-3, rtol=2e-3)
    # Softmax rows must sum to 1 (denominator reciprocal is exact).
    assert jnp.allclose(jnp.sum(out, axis=1), jnp.ones((B,)), atol=1e-4)

    print("KERNEL_OK")
</pallas_src>

<mosaic_0001>
module attributes {stable_mosaic.version = 11 : i64} {
  func.func @ff_softmax_kernel(%arg0: i32, %arg1: memref<8x128xf32, #tpu.memory_space<vmem>>, %arg2: memref<128x128xf32, #tpu.memory_space<vmem>>, %arg3: memref<1x128xf32, #tpu.memory_space<vmem>>, %arg4: memref<1x128xf32, #tpu.memory_space<vmem>>, %arg5: memref<8x128xf32, #tpu.memory_space<vmem>>) attributes {dimension_semantics = [#tpu.dimension_semantics<parallel>], iteration_bounds = array<i64: 1>, scalar_prefetch = 0 : i64, scratch_operands = 0 : i64, tpu.core_type = #tpu.core_type<tc>, window_params = [{transform_indices = @transform_0, window_bounds = array<i64: 8, 128>}, {pipeline_mode = #tpu.pipeline_mode<synchronous>, transform_indices = @transform_1, window_bounds = array<i64: 128, 128>}, {pipeline_mode = #tpu.pipeline_mode<synchronous>, transform_indices = @transform_2, window_bounds = array<i64: 1, 128>}, {pipeline_mode = #tpu.pipeline_mode<synchronous>, transform_indices = @transform_3, window_bounds = array<i64: 1, 128>}, {transform_indices = @transform_4, window_bounds = array<i64: 8, 128>}]} {
    %c0 = arith.constant 0 : index
    %c0_0 = arith.constant 0 : index
    %0 = vector.load %arg1[%c0, %c0_0] : memref<8x128xf32, #tpu.memory_space<vmem>>, vector<8x128xf32>
    %1 = arith.mulf %0, %0 : vector<8x128xf32>
    %cst = arith.constant dense<0.000000e+00> : vector<8xf32>
    %2 = vector.multi_reduction <add>, %1, %cst [1] : vector<8x128xf32> to vector<8xf32>
    %3 = vector.shape_cast %2 : vector<8xf32> to vector<8x1xf32>
    %4 = math.sqrt %3 : vector<8x1xf32>
    %cst_1 = arith.constant 9.99999993E-9 : f32
    %5 = vector.broadcast %cst_1 : f32 to vector<8x1xf32>
    %6 = arith.addf %4, %5 : vector<8x1xf32>
    %7 = tpu.reciprocal %6 {approx = true} : vector<8x1xf32> -> vector<8x1xf32>
    %c0_2 = arith.constant 0 : index
    %c0_3 = arith.constant 0 : index
    %8 = vector.load %arg2[%c0_2, %c0_3] : memref<128x128xf32, #tpu.memory_space<vmem>>, vector<128x128xf32>
    %cst_4 = arith.constant dense<0.000000e+00> : vector<8x128xf32>
    %9 = tpu.matmul %0, %8, %cst_4 {dimension_numbers = #tpu.dot_dimension_numbers<[1], [0], [0], [1], [0, 0, 1, 1], [], []>} : vector<8x128xf32>, vector<128x128xf32>, vector<8x128xf32> -> vector<8x128xf32>
    %10 = vector.broadcast %7 : vector<8x1xf32> to vector<8x128xf32>
    %11 = arith.mulf %9, %10 : vector<8x128xf32>
    %c0_5 = arith.constant 0 : index
    %c0_6 = arith.constant 0 : index
    %12 = vector.load %arg3[%c0_5, %c0_6] : memref<1x128xf32, #tpu.memory_space<vmem>>, vector<1x128xf32>
    %13 = vector.broadcast %12 : vector<1x128xf32> to vector<8x128xf32>
    %14 = arith.addf %11, %13 : vector<8x128xf32>
    %cst_7 = arith.constant 0.000000e+00 : f32
    %15 = vector.broadcast %cst_7 : f32 to vector<8x128xf32>
    %16 = arith.maximumf %14, %15 : vector<8x128xf32>
    %c0_8 = arith.constant 0 : index
    %c0_9 = arith.constant 0 : index
    %17 = vector.load %arg4[%c0_8, %c0_9] : memref<1x128xf32, #tpu.memory_space<vmem>>, vector<1x128xf32>
    %18 = vector.broadcast %17 : vector<1x128xf32> to vector<8x128xf32>
    %19 = arith.addf %16, %18 : vector<8x128xf32>
    %cst_10 = arith.constant dense<0xFF800000> : vector<8xf32>
    %20 = vector.multi_reduction <maximumf>, %19, %cst_10 [1] : vector<8x128xf32> to vector<8xf32>
    %21 = vector.shape_cast %20 : vector<8xf32> to vector<8x1xf32>
    %22 = vector.broadcast %21 : vector<8x1xf32> to vector<8x128xf32>
    %23 = arith.subf %19, %22 : vector<8x128xf32>
    %24 = math.exp %23 : vector<8x128xf32>
    %cst_11 = arith.constant dense<0.000000e+00> : vector<8xf32>
    %25 = vector.multi_reduction <add>, %24, %cst_11 [1] : vector<8x128xf32> to vector<8xf32>
    %26 = vector.shape_cast %25 : vector<8xf32> to vector<8x1xf32>
    %27 = tpu.reciprocal %26 : vector<8x1xf32> -> vector<8x1xf32>
    %28 = vector.broadcast %27 : vector<8x1xf32> to vector<8x128xf32>
    %29 = arith.mulf %24, %28 : vector<8x128xf32>
    %c0_12 = arith.constant 0 : index
    %c0_13 = arith.constant 0 : index
    %30 = vector.load %arg5[%c0_12, %c0_13] : memref<8x128xf32, #tpu.memory_space<vmem>>, vector<8x128xf32>
    tpu.vector_store %arg5[%c0_12, %c0_13], %29 {strides = array<i32>} : memref<8x128xf32, #tpu.memory_space<vmem>>, vector<8x128xf32>,
    return
  }
  func.func @transform_0(%arg0: i32) -> (i32, i32) {
    %c0_i32 = arith.constant 0 : i32
    %c0_i32_0 = arith.constant 0 : i32
    return %arg0, %c0_i32 : i32, i32
  }
  func.func @transform_1(%arg0: i32) -> (i32, i32) {
    %c0_i32 = arith.constant 0 : i32
    %c0_i32_0 = arith.constant 0 : i32
    %c0_i32_1 = arith.constant 0 : i32
    return %c0_i32, %c0_i32_0 : i32, i32
  }
  func.func @transform_2(%arg0: i32) -> (i32, i32) {
    %c0_i32 = arith.constant 0 : i32
    %c0_i32_0 = arith.constant 0 : i32
    %c0_i32_1 = arith.constant 0 : i32
    return %c0_i32, %c0_i32_0 : i32, i32
  }
  func.func @transform_3(%arg0: i32) -> (i32, i32) {
    %c0_i32 = arith.constant 0 : i32
    %c0_i32_0 = arith.constant 0 : i32
    %c0_i32_1 = arith.constant 0 : i32
    return %c0_i32, %c0_i32_0 : i32, i32
  }
  func.func @transform_4(%arg0: i32) -> (i32, i32) {
    %c0_i32 = arith.constant 0 : i32
    %c0_i32_0 = arith.constant 0 : i32
    return %arg0, %c0_i32 : i32, i32
  }
}

</mosaic_0001>

<bundles_post_ra>
// kernel: tpu_custom_call.1
= control target key start
LH: loop header
LB: loop body
LE: loop exit
PB: predicated region body
PF: predicated region fallthrough
CT: control target
= control target key end

     0   :  { %9 = vsyncpa [#allocation3], 0  ;;  %s369_s0 = inlined_call_operand.hbm [shape: f32[8,128], index: 0, kind: input, shape index: {}]   ;;  %s370_s1 = inlined_call_operand.hbm [shape: f32[128,128], index: 1, kind: input, shape index: {}]   ;;  %s371_s2 = inlined_call_operand.vmem [shape: f32[1,128], index: 2, kind: input, shape index: {}]   ;;  %s372_s3 = inlined_call_operand.vmem [shape: f32[1,128], index: 3, kind: input, shape index: {}]   ;;  %s373_s4 = inlined_call_operand.hbm [shape: f32[8,128], index: 4, kind: output, shape index: {}]  }
   0x1   :  { %10 = vsyncpa [#allocation6], 0 }
   0x2   :  { %11 = vsyncpa [#allocation4], 0  ;;  %s322_s15 = smov [#allocation2]   ;;  %s323_s17 = smov [#allocation5]  }
   0x3   :  { %s18_s16 = sshll.u32 %s322_s15, 4  ;;  %s27_s18 = sshll.u32 %s323_s17, 4  ;;  %s19_s16 = int_to_ptr.vmem [resolvable:$true] %s18_s16  ;;  %s28_s18 = int_to_ptr.vmem [resolvable:$true] %s27_s18 }
   0x4   :  { %s264_s19 = scalar_lea.vmem %s19_s16, 128  ;;  %p269_p1 = scmp.lt.s32.totalorder %s19_s16, %s19_s16 }
   0x5   :  { %p265_p0 = scmp.ne.s32.totalorder %s19_s16, %s264_s19  ;;  %p270_p2 = scmp.lt.s32.totalorder %s264_s19, %s264_s19 }
   0x7   :  { %p271_p3 = por %p270_p2, %p269_p1 }
   0x9   :  { %p272_p4 = pnand %p271_p3, %p265_p0 }
   0xb   :  { %275 = shalt.err (!%p272_p4)
}
   0xc   :  { %21 = dma.hbm_to_vmem [thread:$0]  %s369_s0, 128, %s19_s16, [#allocation3]  }
   0xd   :  { %s284_s22 = scalar_lea.vmem %s28_s18, 2048  ;;  %p289_p6 = scmp.lt.s32.totalorder %s28_s18, %s28_s18 }
   0xe   :  { %p285_p5 = scmp.ne.s32.totalorder %s28_s18, %s284_s22  ;;  %p290_p7 = scmp.lt.s32.totalorder %s284_s22, %s284_s22 }
  0x10   :  { %p291_p8 = por %p290_p7, %p289_p6 }
  0x12   :  { %p292_p9 = pnand %p291_p8, %p285_p5 }
  0x14   :  { %295 = shalt.err (!%p292_p9)
}
  0x15   :  { %s324_s23 = smov 128   ;;  %s325_s24 = smov 8  }
  0x16   :  { %33 = dma.hbm_to_vmem [thread:$0]  %s370_s1, 2048, %s28_s18, [#allocation6], %s324_s23, %s324_s23, %s325_s24  }
  0x17   :  { %316 = dma.done.wait [#allocation3], 128  }
  0x18   :  { %317 = vsyncadd [#allocation3], 4294967168 }
  0x19   :  { %318 = dma.done.wait [#allocation6], 2048  }
  0x1a   :  { %319 = vsyncadd [#allocation6], 4294965248  ;;  %v326_v0 = vmov 0.0   ;;  %vm327_vm0 = vmmov 0   ;;  %v72_v1 = vld [vmem:[#allocation5 + $0x78] sm:$0xff]  ;;  %v71_v2 = vld [vmem:[#allocation5 + $0x70] sm:$0xff] }
  0x1b   :  { %206 = vmatprep.subr.mxu0 %v326_v0  ;;  %238 = vmatprep.mubr.msk.f32.mxu0 %vm327_vm0, %v326_v0  ;;  %v70_v3 = vld [vmem:[#allocation5 + $0x68] sm:$0xff]  ;;  %v69_v4 = vld [vmem:[#allocation5 + $0x60] sm:$0xff]  ;;  %v44_v5 = vld [vmem:[#allocation2] sm:$0xff]  ;;  %s328_s29 = smov [#allocation7]  }
  0x1c   :  { %207 = vmatpush3.msra.mxu0 %v72_v1  ;;  %v68_v6 = vld [vmem:[#allocation5 + $0x58] sm:$0xff]  ;;  %v45_v7 = vmul.f32 %v44_v5, %v44_v5  ;;  %v67_v8 = vld [vmem:[#allocation5 + $0x50] sm:$0xff]  ;;  %v66_v9 = vld [vmem:[#allocation5 + $0x48] sm:$0xff] }
  0x1d   :  { %208 = vmatprep.subr.mxu0 %v326_v0  ;;  %v65_v10 = vld [vmem:[#allocation5 + $0x40] sm:$0xff]  ;;  %v64_v11 = vld [vmem:[#allocation5 + $0x38] sm:$0xff]  ;;  %v63_v12 = vld [vmem:[#allocation5 + $0x30] sm:$0xff] }
  0x1e   :  { %209 = vmatpush3.msra.mxu0 %v71_v2  ;;  %46 = vadd.xlane.f32.xlu0 %v45_v7  ;;  %v62_v13 = vld [vmem:[#allocation5 + $0x28] sm:$0xff]  ;;  %v61_v14 = vld [vmem:[#allocation5 + $0x20] sm:$0xff]  ;;  %v60_v15 = vld [vmem:[#allocation5 + $0x18] sm:$0xff] }
  0x1f   :  { %210 = vmatprep.subr.mxu0 %v326_v0  ;;  %v59_v16 = vld [vmem:[#allocation5 + $0x10] sm:$0xff]  ;;  %v58_v17 = vld [vmem:[#allocation5 + $0x8] sm:$0xff]  ;;  %v57_v18 = vld [vmem:[#allocation5] sm:$0xff] }
  0x20   :  { %211 = vmatpush3.msra.mxu0 %v70_v3  ;;  %v187_v28 = vld [vmem:[%s371_s2] ss:$0 sm:$0xff]  ;;  %s177_s2 = sshll.u32 %s328_s29, 4  ;;  %s178_s2 = int_to_ptr.vmem [resolvable:$true] %s177_s2 }
  0x21   :  { %212 = vmatprep.subr.mxu0 %v326_v0  ;;  %v188_v32 = vld [vmem:[%s372_s3] ss:$0 sm:$0xff]  ;;  %s296_s30 = scalar_lea.vmem %s178_s2, 128  ;;  %p301_p11 = scmp.lt.s32.totalorder %s178_s2, %s178_s2 }
  0x22   :  { %213 = vmatpush3.msra.mxu0 %v69_v4  ;;  %p297_p10 = scmp.ne.s32.totalorder %s178_s2, %s296_s30  ;;  %p302_p12 = scmp.lt.s32.totalorder %s296_s30, %s296_s30 }
  0x23   :  { %214 = vmatprep.subr.mxu0 %v326_v0 }
  0x24   :  { %215 = vmatpush3.msra.mxu0 %v68_v6  ;;  %p303_p13 = por %p302_p12, %p301_p11 }
  0x25   :  { %216 = vmatprep.subr.mxu0 %v326_v0 }
  0x26   :  { %217 = vmatpush3.msra.mxu0 %v67_v8  ;;  %p304_p0 = pnand %p303_p13, %p297_p10 }
  0x27   :  { %218 = vmatprep.subr.mxu0 %v326_v0 }
  0x28   :  { %219 = vmatpush3.msra.mxu0 %v66_v9 }
  0x29   :  { %220 = vmatprep.subr.mxu0 %v326_v0 }
  0x2a   :  { %221 = vmatpush3.msra.mxu0 %v65_v10 }
  0x2b   :  { %222 = vmatprep.subr.mxu0 %v326_v0 }
  0x2c   :  { %223 = vmatpush3.msra.mxu0 %v64_v11 }
  0x2d   :  { %224 = vmatprep.subr.mxu0 %v326_v0 }
  0x2e   :  { %225 = vmatpush3.msra.mxu0 %v63_v12 }
  0x2f   :  { %226 = vmatprep.subr.mxu0 %v326_v0 }
  0x30   :  { %227 = vmatpush3.msra.mxu0 %v62_v13 }
  0x31   :  { %228 = vmatprep.subr.mxu0 %v326_v0 }
  0x32   :  { %229 = vmatpush3.msra.mxu0 %v61_v14 }
  0x33   :  { %230 = vmatprep.subr.mxu0 %v326_v0 }
  0x34   :  { %231 = vmatpush3.msra.mxu0 %v60_v15 }
  0x35   :  { %232 = vmatprep.subr.mxu0 %v326_v0 }
  0x36   :  { %233 = vmatpush3.msra.mxu0 %v59_v16 }
  0x37   :  { %234 = vmatprep.subr.mxu0 %v326_v0 }
  0x38   :  { %235 = vmatpush3.msra.mxu0 %v58_v17 }
  0x39   :  { %236 = vmatprep.subr.mxu0 %v326_v0 }
  0x3a   :  { %237 = vmatpush3.msra.mxu0 %v57_v18 }
  0x3b   :  { %239 = vmatmul.mubr.f32.vlgmr.msra.gmra.mxu0 %v44_v5 }
  0xa7   :  { %v47_v19 = vpop.xlane.xlu0 %46 }
  0xa8   :  { %248 = vrsqrt.f32 %v47_v19  ;;  %vm50_vm1 = vcmp.eq.f32.partialorder %v47_v19, inf  ;;  %v53_v22 = vand.u32 2147483648, %v47_v19  ;;  %vm52_vm2 = vcmp.eq.f32.partialorder %v47_v19, 0.0 }
  0xb5   :  { %v249_v20 = vpop.eup %248 }
  0xb6   :  { %v49_v21 = vmul.f32 %v249_v20, %v47_v19 }
  0xb8   :  { %v51_v23 = vsel %vm50_vm1, %v47_v19, %v49_v21 }
  0xb9   :  { %v54_v24 = vsel %vm52_vm2, %v53_v22, %v51_v23 }
  0xba   :  { %v55_v25 = vadd.f32 1e-08, %v54_v24 }
  0xbc   :  { %250 = vrcp.f32 %v55_v25 }
  0xc9   :  { %v251_v26 = vpop.eup %250 }
  0xfb   :  { %v139_v27 = vpop.f32.mrf.mxu0 }
  0xfc   :  { %v143_v29 = vmul.f32 %v251_v26, %v139_v27 }
  0xfd   :  { %v240_v30 = vpop.f32.mrf.mxu0 }
  0xfe   :  { %v151_v31 = vadd.f32 %v187_v28, %v143_v29 }
 0x100   :  { %v152_v33 = vmax.f32 %v151_v31, 0.0 }
 0x102   :  { %v160_v34 = vadd.f32 %v188_v32, %v152_v33 }
 0x104   :  { %161 = vmax.xlane.f32.xlu0 %v160_v34 }
 0x18d   :  { %v162_v35 = vpop.xlane.xlu0 %161 }
 0x18e   :  { %v163_v36 = vsub.f32 %v160_v34, %v162_v35 }
 0x190   :  { %v164_v37 = vmul.f32 1.442695, %v163_v36 }
 0x192   :  { %252 = vpow2.f32 %v164_v37 }
 0x19f   :  { %v253_v38 = vpop.eup %252 }
 0x1a0   :  { %166 = vadd.xlane.f32.xlu1 %v253_v38 }
 0x229   :  { %v167_v39 = vpop.xlane.xlu1 %166 }
 0x22a   :  { %254 = vrcp.f32 %v167_v39 }
 0x237   :  { %v255_v40 = vpop.eup %254 }
 0x238   :  { %v169_v41 = vmul.f32 %v255_v40, %v253_v38 }
 0x23a   :  { %170 = vst [vmem:[#allocation7] sm:$0xff] %v169_v41 }
 0x23b   :  { %307 = shalt.err (!%p304_p0)
}
 0x23c   :  { %180 = dma.vmem_to_hbm [thread:$0]  %s178_s2, 128, %s373_s4, [#allocation4]  }
 0x23d   :  { %320 = dma.done.wait [#allocation4], 128  }
 0x23e   :  { %321 = vsyncadd [#allocation4], 4294967168 }
 0x23f   :  { %184 = vsyncpa [#allocation3], 1 }
 0x240   :  { %185 = vsyncpa [#allocation6], 1 }
 0x241   :  { %186 = vsyncpa [#allocation4], 1 }

</bundles_post_ra>
